<compile_context>
chip_gen: v7x
topology: tpu7x:2x2x1
jax: 0.10.0
libtpu: 0.0.40
codegen_flags: <defaults>
</compile_context>

<pallas_src>
import jax
import jax.numpy as jnp
from jax.experimental import pallas as pl
from jax.experimental.pallas import tpu as pltpu


def _round_up(n, m):
    return ((n + m - 1) // m) * m


def _lr_kernel(x_ref, w1_ref, b1_ref, w2_ref, b2_ref, w3_ref, b3_ref, o_ref):
    # Shapes (transposed, batch-on-lanes layout):
    #   x_ref : (dim, TB)    w1_ref: (80, dim)   b1_ref: (80, 1)
    #   h1    : (80, TB)     w2_ref: (10, 80)    b2_ref: (10, 1)
    #   h2    : (10, TB)     w3_ref: (10, 1)     b3_ref: (1,)  [SMEM scalar]
    #   o_ref : (1, TB)      -> lane-dense output stores
    x = x_ref[...]

    # Layer 1: MXU matmul; N = TB rides the lane axis, f32 accumulation.
    h1 = jnp.dot(w1_ref[...], x, preferred_element_type=jnp.float32)
    h1 = jnp.maximum(h1 + b1_ref[...], 0.0)                       # (80, TB)
    # TODO(synk): dropout omitted (inference / eval semantics -> identity)

    # Layer 2: MXU matmul (K=80), still lane-dense over the batch tile.
    h2 = jnp.dot(w2_ref[...], h1, preferred_element_type=jnp.float32)
    h2 = jnp.maximum(h2 + b2_ref[...], 0.0)                       # (10, TB)

    # Layer 3: single output neuron -> skip the MXU; VPU broadcast-multiply
    # plus a 10-row sublane reduction, then add the scalar bias from SMEM.
    out = jnp.sum(w3_ref[...] * h2, axis=0, keepdims=True)        # (1, TB)
    o_ref[...] = out + b3_ref[0]


def lr_forward(x, w1, b1, w2, b2, w3, b3, *, tb=2048):
    """Fused LR MLP forward.

    x : (B, dim) f32
    w1: (80, dim)  b1: (80, 1)
    w2: (10, 80)   b2: (10, 1)
    w3: (10, 1)    b3: (1,)
    Returns (B,) f32, matching torch's `fc_3(x).squeeze(dim=1)`.
    """
    B, dim = x.shape
    h1_dim = w1.shape[0]
    h2_dim = w2.shape[0]

    # Batch tile on the lane axis; pad B up to a multiple of the tile.
    tb = min(tb, _round_up(B, 128))
    Bp = _round_up(B, tb)
    xt = jnp.zeros((dim, Bp), jnp.float32).at[:, :B].set(x.T)

    grid = (Bp // tb,)
    flops = 2 * Bp * (dim * h1_dim + h1_dim * h2_dim + h2_dim)
    bytes_accessed = 4 * (dim * Bp + Bp                     # x in, y out
                          + h1_dim * dim + h1_dim           # w1, b1
                          + h2_dim * h1_dim + h2_dim        # w2, b2
                          + h2_dim + 1)                     # w3, b3

    out = pl.pallas_call(
        _lr_kernel,
        out_shape=jax.ShapeDtypeStruct((1, Bp), jnp.float32),
        grid=grid,
        in_specs=[
            pl.BlockSpec((dim, tb), lambda i: (0, i)),          # x tile (streamed)
            pl.BlockSpec((h1_dim, dim), lambda i: (0, 0)),      # w1 (VMEM-resident)
            pl.BlockSpec((h1_dim, 1), lambda i: (0, 0)),        # b1
            pl.BlockSpec((h2_dim, h1_dim), lambda i: (0, 0)),   # w2
            pl.BlockSpec((h2_dim, 1), lambda i: (0, 0)),        # b2
            pl.BlockSpec((h2_dim, 1), lambda i: (0, 0)),        # w3 column
            pl.BlockSpec(memory_space=pltpu.MemorySpace.SMEM),  # b3 scalar
        ],
        out_specs=pl.BlockSpec((1, tb), lambda i: (0, i)),
        compiler_params=pltpu.CompilerParams(
            dimension_semantics=("parallel",)),
        cost_estimate=pl.CostEstimate(
            flops=flops, transcendentals=0, bytes_accessed=bytes_accessed),
    )(xt, w1, b1, w2, b2, w3, b3)

    return out[0, :B]


def init_params(key, dim):
    # Deterministic init mimicking torch.nn.Linear defaults:
    # U(-1/sqrt(fan_in), 1/sqrt(fan_in)) for both weights and biases.
    # Weights kept in torch layout (out, in) == what the transposed kernel wants.
    ks = jax.random.split(key, 6)

    def lin(kw, kb, fan_in, fan_out):
        bound = 1.0 / (float(fan_in) ** 0.5)
        w = jax.random.uniform(kw, (fan_out, fan_in), jnp.float32, -bound, bound)
        b = jax.random.uniform(kb, (fan_out, 1), jnp.float32, -bound, bound)
        return w, b

    w1, b1 = lin(ks[0], ks[1], dim, 80)
    w2, b2 = lin(ks[2], ks[3], 80, 10)
    w3, b3 = lin(ks[4], ks[5], 10, 1)
    # Kernel consumes w3 as a (10, 1) column and b3 as a flat SMEM scalar.
    return w1, b1, w2, b2, w3.T, b3.reshape(1)


def _reference(x, w1, b1, w2, b2, w3c, b3):
    # Plain-JAX reference (eval-mode dropout = identity).
    h1 = jnp.maximum(x @ w1.T + b1.T, 0.0)
    h2 = jnp.maximum(h1 @ w2.T + b2.T, 0.0)
    return (h2 @ w3c)[:, 0] + b3[0]


if __name__ == "__main__":
    key = jax.random.PRNGKey(0)
    k_x, k_p, k_x2 = jax.random.split(key, 3)

    batch, dim = 8, 32
    x = jax.random.normal(k_x, (batch, dim), dtype=jnp.float32)
    params = init_params(k_p, dim)

    y = lr_forward(x, *params)
    jax.block_until_ready(y)
    ref = _reference(x, *params)
    assert y.shape == (batch,)
    assert jnp.allclose(y, ref, atol=1e-4, rtol=1e-4)

    # Second check: multi-step grid + batch padding path (tb=128, B=300 -> 3 steps).
    x2 = jax.random.normal(k_x2, (300, dim), dtype=jnp.float32)
    y2 = lr_forward(x2, *params, tb=128)
    jax.block_until_ready(y2)
    ref2 = _reference(x2, *params)
    assert y2.shape == (300,)
    assert jnp.allclose(y2, ref2, atol=1e-4, rtol=1e-4)

    print("KERNEL_OK")
</pallas_src>

<mosaic_0001>
module attributes {stable_mosaic.version = 11 : i64} {
  func.func @_lr_kernel(%arg0: i32, %arg1: memref<32x128xf32, #tpu.memory_space<vmem>>, %arg2: memref<80x32xf32, #tpu.memory_space<vmem>>, %arg3: memref<80x1xf32, #tpu.memory_space<vmem>>, %arg4: memref<10x80xf32, #tpu.memory_space<vmem>>, %arg5: memref<10x1xf32, #tpu.memory_space<vmem>>, %arg6: memref<10x1xf32, #tpu.memory_space<vmem>>, %arg7: memref<1xf32, #tpu.memory_space<smem>>, %arg8: memref<1x128xf32, #tpu.memory_space<vmem>>) attributes {dimension_semantics = [#tpu.dimension_semantics<parallel>], iteration_bounds = array<i64: 1>, scalar_prefetch = 0 : i64, scratch_operands = 0 : i64, tpu.core_type = #tpu.core_type<tc>, window_params = [{transform_indices = @transform_0, window_bounds = array<i64: 32, 128>}, {pipeline_mode = #tpu.pipeline_mode<synchronous>, transform_indices = @transform_1, window_bounds = array<i64: 80, 32>}, {pipeline_mode = #tpu.pipeline_mode<synchronous>, transform_indices = @transform_2, window_bounds = array<i64: 80, 1>}, {pipeline_mode = #tpu.pipeline_mode<synchronous>, transform_indices = @transform_3, window_bounds = array<i64: 10, 80>}, {pipeline_mode = #tpu.pipeline_mode<synchronous>, transform_indices = @transform_4, window_bounds = array<i64: 10, 1>}, {pipeline_mode = #tpu.pipeline_mode<synchronous>, transform_indices = @transform_5, window_bounds = array<i64: 10, 1>}, {transform_indices = @transform_6, window_bounds = array<i64: 1>}, {transform_indices = @transform_7, window_bounds = array<i64: 1, 128>}]} {
    %c0 = arith.constant 0 : index
    %c0_0 = arith.constant 0 : index
    %0 = vector.load %arg1[%c0, %c0_0] : memref<32x128xf32, #tpu.memory_space<vmem>>, vector<32x128xf32>
    %c0_1 = arith.constant 0 : index
    %c0_2 = arith.constant 0 : index
    %1 = vector.load %arg2[%c0_1, %c0_2] : memref<80x32xf32, #tpu.memory_space<vmem>>, vector<80x32xf32>
    %cst = arith.constant dense<0.000000e+00> : vector<80x128xf32>
    %2 = tpu.matmul %1, %0, %cst {dimension_numbers = #tpu.dot_dimension_numbers<[1], [0], [0], [1], [0, 0, 1, 1], [], []>} : vector<80x32xf32>, vector<32x128xf32>, vector<80x128xf32> -> vector<80x128xf32>
    %c0_3 = arith.constant 0 : index
    %c0_4 = arith.constant 0 : index
    %3 = vector.load %arg3[%c0_3, %c0_4] : memref<80x1xf32, #tpu.memory_space<vmem>>, vector<80x1xf32>
    %4 = vector.broadcast %3 : vector<80x1xf32> to vector<80x128xf32>
    %5 = arith.addf %2, %4 : vector<80x128xf32>
    %cst_5 = arith.constant 0.000000e+00 : f32
    %6 = vector.broadcast %cst_5 : f32 to vector<80x128xf32>
    %7 = arith.maximumf %5, %6 : vector<80x128xf32>
    %c0_6 = arith.constant 0 : index
    %c0_7 = arith.constant 0 : index
    %8 = vector.load %arg4[%c0_6, %c0_7] : memref<10x80xf32, #tpu.memory_space<vmem>>, vector<10x80xf32>
    %cst_8 = arith.constant dense<0.000000e+00> : vector<10x128xf32>
    %9 = tpu.matmul %8, %7, %cst_8 {dimension_numbers = #tpu.dot_dimension_numbers<[1], [0], [0], [1], [0, 0, 1, 1], [], []>} : vector<10x80xf32>, vector<80x128xf32>, vector<10x128xf32> -> vector<10x128xf32>
    %c0_9 = arith.constant 0 : index
    %c0_10 = arith.constant 0 : index
    %10 = vector.load %arg5[%c0_9, %c0_10] : memref<10x1xf32, #tpu.memory_space<vmem>>, vector<10x1xf32>
    %11 = vector.broadcast %10 : vector<10x1xf32> to vector<10x128xf32>
    %12 = arith.addf %9, %11 : vector<10x128xf32>
    %cst_11 = arith.constant 0.000000e+00 : f32
    %13 = vector.broadcast %cst_11 : f32 to vector<10x128xf32>
    %14 = arith.maximumf %12, %13 : vector<10x128xf32>
    %c0_12 = arith.constant 0 : index
    %c0_13 = arith.constant 0 : index
    %15 = vector.load %arg6[%c0_12, %c0_13] : memref<10x1xf32, #tpu.memory_space<vmem>>, vector<10x1xf32>
    %16 = vector.broadcast %15 : vector<10x1xf32> to vector<10x128xf32>
    %17 = arith.mulf %16, %14 : vector<10x128xf32>
    %cst_14 = arith.constant dense<0.000000e+00> : vector<128xf32>
    %18 = vector.multi_reduction <add>, %17, %cst_14 [0] : vector<10x128xf32> to vector<128xf32>
    %19 = vector.shape_cast %18 : vector<128xf32> to vector<1x128xf32>
    %c0_15 = arith.constant 0 : index
    %20 = memref.load %arg7[%c0_15] : memref<1xf32, #tpu.memory_space<smem>>
    %21 = vector.broadcast %20 : f32 to vector<1x128xf32>
    %22 = arith.addf %19, %21 : vector<1x128xf32>
    %c0_16 = arith.constant 0 : index
    %c0_17 = arith.constant 0 : index
    %23 = vector.load %arg8[%c0_16, %c0_17] : memref<1x128xf32, #tpu.memory_space<vmem>>, vector<1x128xf32>
    tpu.vector_store %arg8[%c0_16, %c0_17], %22 {strides = array<i32>} : memref<1x128xf32, #tpu.memory_space<vmem>>, vector<1x128xf32>,
    return
  }
  func.func @transform_0(%arg0: i32) -> (i32, i32) {
    %c0_i32 = arith.constant 0 : i32
    %c0_i32_0 = arith.constant 0 : i32
    return %c0_i32, %arg0 : i32, i32
  }
  func.func @transform_1(%arg0: i32) -> (i32, i32) {
    %c0_i32 = arith.constant 0 : i32
    %c0_i32_0 = arith.constant 0 : i32
    %c0_i32_1 = arith.constant 0 : i32
    return %c0_i32, %c0_i32_0 : i32, i32
  }
  func.func @transform_2(%arg0: i32) -> (i32, i32) {
    %c0_i32 = arith.constant 0 : i32
    %c0_i32_0 = arith.constant 0 : i32
    %c0_i32_1 = arith.constant 0 : i32
    return %c0_i32, %c0_i32_0 : i32, i32
  }
  func.func @transform_3(%arg0: i32) -> (i32, i32) {
    %c0_i32 = arith.constant 0 : i32
    %c0_i32_0 = arith.constant 0 : i32
    %c0_i32_1 = arith.constant 0 : i32
    return %c0_i32, %c0_i32_0 : i32, i32
  }
  func.func @transform_4(%arg0: i32) -> (i32, i32) {
    %c0_i32 = arith.constant 0 : i32
    %c0_i32_0 = arith.constant 0 : i32
    %c0_i32_1 = arith.constant 0 : i32
    return %c0_i32, %c0_i32_0 : i32, i32
  }
  func.func @transform_5(%arg0: i32) -> (i32, i32) {
    %c0_i32 = arith.constant 0 : i32
    %c0_i32_0 = arith.constant 0 : i32
    %c0_i32_1 = arith.constant 0 : i32
    return %c0_i32, %c0_i32_0 : i32, i32
  }
  func.func @transform_6(%arg0: i32) -> i32 {
    %c0_i32 = arith.constant 0 : i32
    %c0_i32_0 = arith.constant 0 : i32
    return %c0_i32 : i32
  }
  func.func @transform_7(%arg0: i32) -> (i32, i32) {
    %c0_i32 = arith.constant 0 : i32
    %c0_i32_0 = arith.constant 0 : i32
    return %c0_i32, %arg0 : i32, i32
  }
}

</mosaic_0001>

<bundles_post_ra>
// kernel: tpu_custom_call.1
= control target key start
LH: loop header
LB: loop body
LE: loop exit
PB: predicated region body
PF: predicated region fallthrough
CT: control target
= control target key end

     0   :  { %vm102_vm0 = vcmask 261120   ;;  %v537_v6 = vmov 0   ;;  %s696_s0 = inlined_call_operand.vmem [shape: f32[32,128], index: 0, kind: input, shape index: {}]   ;;  %s697_s1 = inlined_call_operand.vmem [shape: f32[80,32], index: 1, kind: input, shape index: {}]   ;;  %s698_s2 = inlined_call_operand.vmem [shape: f32[80,1], index: 2, kind: input, shape index: {}]   ;;  %s699_s3 = inlined_call_operand.vmem [shape: f32[10,80], index: 3, kind: input, shape index: {}]   ;;  %s700_s4 = inlined_call_operand.vmem [shape: f32[10,1], index: 4, kind: input, shape index: {}]   ;;  %s701_s5 = inlined_call_operand.vmem [shape: f32[10,1], index: 5, kind: input, shape index: {}]   ;;  %s702_s6 = inlined_call_operand.<no memory space> [shape: f32[1], index: 6, kind: input, shape index: {}]   ;;  %s703_s7 = inlined_call_operand.hbm [shape: f32[1,128], index: 7, kind: output, shape index: {}]  }
   0x1   :  { %v28_v0 = vld [vmem:[%s696_s0] sm:$0xff]  ;;  %v29_v1 = vld [vmem:[%s696_s0 + $0x8] sm:$0xff]  ;;  %v30_v2 = vld [vmem:[%s696_s0 + $0x10] sm:$0xff]  ;;  %511 = vset.pattern.permute.xlu0 %v537_v6  ;;  %512 = vset.pattern.permute.xlu1 %v537_v6 }
   0x2   :  { %v481_v3 = vpack.c.bf16 %v29_v1, %v28_v0  ;;  %v31_v4 = vld [vmem:[%s696_s0 + $0x18] sm:$0xff]  ;;  %v32_v5 = vld [vmem:[%s697_s1] sm:$0xff]  ;;  %v44_v9 = vld [vmem:[%s698_s2 + $0x10] sm:$0xff] }
   0x3   :  { %v485_v7 = vpack.c.bf16 %v31_v4, %v30_v2  ;;  %443 = vmatprep.mubr.msk.f32.mxu0 %vm102_vm0, %v32_v5  ;;  %v42_v8 = vld [vmem:[%s698_s2] sm:$0xff]  ;;  %64 = vperm.xlu1 %512, %v44_v9   ;;  %v43_v10 = vld [vmem:[%s698_s2 + $0x8] sm:$0xff]  ;;  %v45_v11 = vld [vmem:[%s698_s2 + $0x18] sm:$0xff] }
   0x4   :  { %482 = vmatprep.subr.bf16.mxu0 %v481_v3  ;;  %54 = vperm.xlu0 %511, %v42_v8   ;;  %v33_v12 = vld [vmem:[%s697_s1 + $0x8] sm:$0xff]  ;;  %v34_v13 = vld [vmem:[%s697_s1 + $0x10] sm:$0xff] }
   0x5   :  { %484 = vmatpush3.bf16.msra.mxu0 %v481_v3 }
   0x6   :  { %486 = vmatprep.subr.bf16.mxu0 %v485_v7 }
   0x8   :  { %59 = vperm.xlu0 %511, %v43_v10  }
   0x9   :  { %488 = vmatpush3.bf16.msra.mxu0 %v485_v7 }
   0xa   :  { %13 = vsyncpa [#allocation4], 0  ;;  %69 = vperm.xlu1 %512, %v45_v11   ;;  %v46_v14 = vld [vmem:[%s698_s2 + $0x20] sm:$0xff]  ;;  %v47_v15 = vld [vmem:[%s698_s2 + $0x28] sm:$0xff]  ;;  %vm272_vm1 = vcmask 654336   ;;  %vm370_vm2 = vcmask 1041408  }
   0xb   :  { %v35_v16 = vld [vmem:[%s697_s1 + $0x18] sm:$0xff]  ;;  %v36_v17 = vld [vmem:[%s697_s1 + $0x20] sm:$0xff]  ;;  %v48_v18 = vld [vmem:[%s698_s2 + $0x30] sm:$0xff]  ;;  %s538_s10 = smov [#allocation3]  }
   0xc   :  { %444 = vmatmul.mubr.msk.f32.vlgmr.msra.gmra.mrb[0].mxu0 %vm102_vm0, %v33_v12  ;;  %74 = vperm.xlu0 %511, %v46_v14   ;;  %v49_v19 = vld [vmem:[%s698_s2 + $0x38] sm:$0xff]  ;;  %v37_v20 = vld [vmem:[%s697_s1 + $0x28] sm:$0xff]  ;;  %v38_v21 = vld [vmem:[%s697_s1 + $0x30] sm:$0xff]  ;;  %s389_s11 = sshll.u32 %s538_s10, 4  ;;  %s390_s11 = int_to_ptr.vmem [resolvable:$true] %s389_s11 }
   0xd   :  { %446 = vmatprep.mubr.msk.f32.mxu0 %vm102_vm0, %v34_v13  ;;  %v50_v22 = vld [vmem:[%s698_s2 + $0x40] sm:$0xff]  ;;  %v51_v23 = vld [vmem:[%s698_s2 + $0x48] sm:$0xff]  ;;  %v39_v24 = vld [vmem:[%s697_s1 + $0x38] sm:$0xff]  ;;  %s513_s12 = scalar_lea.vmem %s390_s11, 16  ;;  %s517_s13 = scalar_lea.vmem %s390_s11, 32 }
   0xe   :  { %79 = vperm.xlu1 %512, %v47_v15   ;;  %v40_v25 = vld [vmem:[%s697_s1 + $0x40] sm:$0xff]  ;;  %v261_v26 = vld [vmem:[%s700_s4 + $0x8] sm:$0x3]  ;;  %p514_p0 = scmp.ne.s32.totalorder %s390_s11, %s513_s12  ;;  %p518_p1 = scmp.lt.s32.totalorder %s390_s11, %s390_s11 }
   0xf   :  { %v260_v27 = vld [vmem:[%s700_s4] sm:$0xff]  ;;  %v41_v28 = vld [vmem:[%s697_s1 + $0x48] sm:$0xff]  ;;  %p519_p2 = scmp.lt.s32.totalorder %s517_s13, %s513_s12 }
  0x10   :  { %447 = vmatmul.mubr.msk.f32.gmra.mrb[2].mxu0 %vm102_vm0, %v35_v16  ;;  %84 = vperm.xlu0 %511, %v48_v18   ;;  %v357_v29 = vld [vmem:[%s701_s5 + $0x8] sm:$0x3]  ;;  %v356_v30 = vld [vmem:[%s701_s5] sm:$0xff] }
  0x11   :  { %449 = vmatprep.mubr.msk.f32.mxu0 %vm102_vm0, %v36_v17  ;;  %v258_v31 = vld [vmem:[%s699_s3] sm:$0xff]  ;;  %v259_v13 = vld [vmem:[%s699_s3 + $0x8] sm:$0x3]  ;;  %p520_p3 = por %p519_p2, %p518_p1 }
  0x12   :  { %89 = vperm.xlu1 %512, %v49_v19   ;;  %478 = vmatprep.mubr.msk.f32.mxu1 %vm272_vm1, %v258_v31 }
  0x13   :  { %p521_p4 = pnand %p520_p3, %p514_p0 }
  0x14   :  { %450 = vmatmul.mubr.msk.f32.gmra.mrb[4].mxu0 %vm102_vm0, %v37_v20  ;;  %94 = vperm.xlu0 %511, %v50_v22  }
  0x15   :  { %452 = vmatprep.mubr.msk.f32.mxu0 %vm102_vm0, %v38_v21 }
  0x16   :  { %99 = vperm.xlu1 %512, %v51_v23  }
  0x18   :  { %453 = vmatmul.mubr.msk.f32.gmra.mrb[6].mxu0 %vm102_vm0, %v39_v24  ;;  %269 = vperm.xlu0 %511, %v261_v26  }
  0x19   :  { %455 = vmatprep.mubr.msk.f32.mxu0 %vm102_vm0, %v40_v25 }
  0x1a   :  { %264 = vperm.xlu1 %512, %v260_v27  }
  0x1c   :  { %456 = vmatmul.mubr.msk.f32.gmra.mrb[8].mxu0 %vm102_vm0, %v41_v28  ;;  %365 = vperm.xlu0 %511, %v357_v29  }
  0x1e   :  { %360 = vperm.xlu1 %512, %v356_v30  }
  0x82   :  { %v65_v32 = vpop.permute.xlu1 %64 }
  0x83   :  { %v55_v33 = vpop.permute.xlu0 %54 }
  0x87   :  { %v60_v35 = vpop.permute.xlu0 %59 }
  0x89   :  { %v70_v34 = vpop.permute.xlu1 %69 }
  0x8b   :  { %v75_v44 = vpop.permute.xlu0 %74 }
  0x8d   :  { %v80_v41 = vpop.permute.xlu1 %79 }
  0x8f   :  { %v85_v57 = vpop.permute.xlu0 %84 }
  0x91   :  { %v90_v54 = vpop.permute.xlu1 %89 }
  0x93   :  { %v95_v5 = vpop.permute.xlu0 %94 }
  0x95   :  { %v100_v2 = vpop.permute.xlu1 %99 }
  0x97   :  { %v270_v14 = vpop.permute.xlu0 %269 }
  0x99   :  { %v265_v15 = vpop.permute.xlu1 %264 }
  0x9b   :  { %v366_v21 = vpop.permute.xlu0 %365 }
  0x9d   :  { %v361_v23 = vpop.permute.xlu1 %360 }
  0xdf   :  { %v445_v36 = vpop.f32.mrb[0].mxu0 }
  0xe0   :  { %v205_v37 = vadd.f32 %v445_v36, %v60_v35  ;;  %v199_v38 = vpop.f32.mrb[1].mxu0 }
  0xe1   :  { %v200_v39 = vadd.f32 %v199_v38, %v55_v33  ;;  %v380_v33 = vstv %s702_s6 }
  0xe2   :  { %v249_v40 = vmax.f32 %v205_v37, 0.0 }
  0xe3   :  { %v248_v42 = vmax.f32 %v200_v39, 0.0  ;;  %v448_v43 = vpop.f32.mrb[2].mxu0 }
  0xe4   :  { %v215_v45 = vadd.f32 %v448_v43, %v70_v34  ;;  %v209_v46 = vpop.f32.mrb[3].mxu0 }
  0xe5   :  { %v210_v47 = vadd.f32 %v209_v46, %v65_v32  ;;  %v489_v48 = vpack.c.bf16 %v249_v40, %v248_v42 }
  0xe6   :  { %v251_v49 = vmax.f32 %v215_v45, 0.0 }
  0xe7   :  { %v250_v50 = vmax.f32 %v210_v47, 0.0  ;;  %v451_v51 = vpop.f32.mrb[4].mxu0  ;;  %490 = vmatprep.subr.bf16.mxu1 %v489_v48 }
  0xe8   :  { %v225_v52 = vadd.f32 %v451_v51, %v80_v41  ;;  %v219_v53 = vpop.f32.mrb[5].mxu0  ;;  %492 = vmatpush3.bf16.msra.mxu1 %v489_v48 }
  0xe9   :  { %v493_v55 = vpack.c.bf16 %v251_v49, %v250_v50  ;;  %v220_v56 = vadd.f32 %v219_v53, %v75_v44 }
  0xea   :  { %v253_v58 = vmax.f32 %v225_v52, 0.0 }
  0xeb   :  { %v252_v59 = vmax.f32 %v220_v56, 0.0  ;;  %v454_v60 = vpop.f32.mrb[6].mxu0  ;;  %494 = vmatprep.subr.bf16.mxu1 %v493_v55 }
  0xec   :  { %v235_v61 = vadd.f32 %v454_v60, %v90_v54  ;;  %v229_v62 = vpop.f32.mrb[7].mxu0  ;;  %496 = vmatpush3.bf16.msra.mxu1 %v493_v55 }
  0xed   :  { %v497_v63 = vpack.c.bf16 %v253_v58, %v252_v59  ;;  %v230_v0 = vadd.f32 %v229_v62, %v85_v57 }
  0xee   :  { %v255_v1 = vmax.f32 %v235_v61, 0.0 }
  0xef   :  { %v254_v3 = vmax.f32 %v230_v0, 0.0  ;;  %v457_v4 = vpop.f32.mrb[8].mxu0  ;;  %498 = vmatprep.subr.bf16.mxu1 %v497_v63 }
  0xf0   :  { %v245_v6 = vadd.f32 %v457_v4, %v100_v2  ;;  %v239_v7 = vpop.f32.mrb[9].mxu0  ;;  %500 = vmatpush3.bf16.msra.mxu1 %v497_v63 }
  0xf1   :  { %v501_v8 = vpack.c.bf16 %v255_v1, %v254_v3  ;;  %v240_v9 = vadd.f32 %v239_v7, %v95_v5 }
  0xf2   :  { %v257_v10 = vmax.f32 %v245_v6, 0.0 }
  0xf3   :  { %v256_v11 = vmax.f32 %v240_v9, 0.0  ;;  %502 = vmatprep.subr.bf16.mxu1 %v501_v8 }
  0xf4   :  { %504 = vmatpush3.bf16.msra.mxu1 %v501_v8 }
  0xf5   :  { %v505_v12 = vpack.c.bf16 %v257_v10, %v256_v11 }
  0xf7   :  { %506 = vmatprep.subr.bf16.mxu1 %v505_v12 }
  0xf8   :  { %508 = vmatpush3.bf16.msra.mxu1 %v505_v12 }
  0xfb   :  { %479 = vmatmul.mubr.msk.f32.vlgmr.msra.gmra.mrb[0].mxu1 %vm272_vm1, %v259_v13 }
 0x1ce   :  { %v480_v16 = vpop.f32.mrb[0].mxu1 }
 0x1cf   :  { %v351_v17 = vadd.f32 %v480_v16, %v270_v14  ;;  %v345_v18 = vpop.f32.mrb[1].mxu1 }
 0x1d0   :  { %v346_v19 = vadd.f32 %v345_v18, %v265_v15 }
 0x1d1   :  { %v355_v20 = vmax.f32 %v351_v17, 0.0 }
 0x1d2   :  { %v354_v22 = vmax.f32 %v346_v19, 0.0 }
 0x1d3   :  { %v369_v24 = vmul.f32 %v366_v21, %v355_v20 }
 0x1d4   :  { %v368_v25 = vmul.f32 %v361_v23, %v354_v22 }
 0x1d5   :  { %v371_v26 = vsel %vm370_vm2, %v369_v24, 0.0 }
 0x1d6   :  { %v372_v27 = vadd.f32 %v371_v26, %v368_v25 }
 0x1d8   :  { %v373_v28 = vrot.slane %v372_v27, 4 }
 0x1da   :  { %v374_v29 = vadd.f32 %v373_v28, %v372_v27 }
 0x1dc   :  { %v375_v30 = vrot.slane %v374_v29, 2 }
 0x1de   :  { %v376_v31 = vadd.f32 %v375_v30, %v374_v29 }
 0x1e0   :  { %v377_v32 = vrot.slane %v376_v31, 1 }
 0x1e2   :  { %v378_v34 = vadd.f32 %v377_v32, %v376_v31 }
 0x1e4   :  { %v381_v35 = vadd.f32 %v380_v33, %v378_v34 }
 0x1e6   :  { %382 = vst [vmem:[#allocation3] sm:$0x1] %v381_v35 }
 0x1e7   :  { %524 = shalt.err (!%p521_p4)
}
 0x1e8   :  { %s525_s15 = scalar_lea.hbm %s703_s7, 16 }
 0x1e9   :  { %p526_p5 = scmp.ne.s32.totalorder %s703_s7, %s525_s15  ;;  %p529_p6 = scmp.lt.u32.totalorder %s525_s15, %s703_s7 }
 0x1eb   :  { %p531_p7 = pnand %p529_p6, %p526_p5 }
 0x1ed   :  { %534 = shalt.err (!%p531_p7)
}
 0x1ee   :  { %392 = dma.vmem_to_hbm [thread:$0]  %s390_s11, 16, %s703_s7, [#allocation4]  }
 0x1ef   :  { %535 = dma.done.wait [#allocation4], 16  }
 0x1f0   :  { %536 = vsyncadd [#allocation4], 4294967280 }
 0x1f1   :  { %396 = vsyncpa [#allocation4], 1 }

</bundles_post_ra>
